<compile_context>
chip_gen: v7x
topology: tpu7x:2x2x1
jax: 0.10.0
libtpu: 0.0.40
codegen_flags: <defaults>
</compile_context>

<pallas_src>
import math
import functools

import jax
import jax.numpy as jnp
from jax.experimental import pallas as pl
from jax.experimental.pallas import tpu as pltpu


# ----------------------------------------------------------------------------
# kernels
# ----------------------------------------------------------------------------
def _pe_add_kernel(x_ref, pe_ref, o_ref):
    # x_ref : (TB, S, D)   pe_ref : (TB, 1, D)  -> broadcast over the S axis
    o_ref[...] = (x_ref[...] + pe_ref[...]).astype(o_ref.dtype)


def _pe_add_dropout_kernel(x_ref, pe_ref, bits_ref, o_ref, *, threshold, scale):
    # bits_ref : (TB, S, D) uint32 uniform bits.
    # drop iff bits < threshold  (P = threshold / 2^32 = p)  -> keep prob 1-p.
    val = x_ref[...] + pe_ref[...]
    keep = bits_ref[...] >= jnp.uint32(threshold)
    gain = jnp.where(keep, jnp.float32(scale), jnp.float32(0.0))
    o_ref[...] = (val * gain).astype(o_ref.dtype)


# ----------------------------------------------------------------------------
# parameter construction (identical to the PyTorch __init__)
# ----------------------------------------------------------------------------
def make_positional_encoding(input_size, max_len=5000):
    position = jnp.arange(max_len, dtype=jnp.float32)[:, None]             # (L, 1)
    div_term = jnp.exp(
        jnp.arange(0, input_size, 2, dtype=jnp.float32)
        * (-math.log(10000.0) / input_size)
    )                                                                       # (D/2,)
    pe = jnp.zeros((max_len, input_size), dtype=jnp.float32)
    pe = pe.at[:, 0::2].set(jnp.sin(position * div_term))
    pe = pe.at[:, 1::2].set(jnp.cos(position * div_term))
    # pe.unsqueeze(0).transpose(0, 1)  ->  (max_len, 1, input_size)
    return pe[:, None, :]


# ----------------------------------------------------------------------------
# forward
# ----------------------------------------------------------------------------
def positional_encoding_forward(x, pe, *, p=0.1, training=False, rng_key=None):
    """x: (B, S, D);  pe: (max_len, 1, D).  Module's broadcast needs B == S."""
    B, S, D = x.shape
    pe_slice = pe[:S]                       # exactly self.pe[:x.size(1), :] -> (S, 1, D)
    assert pe_slice.shape[0] == B, "original module's broadcast requires batch == seq"

    # Block sizing: ~2 MiB of x per block.  Leading axis is tiled; (S, D) stay
    # full-extent.  Double-buffered streams (x, bits, out) stay well under the
    # 16 MiB v5e default scoped VMEM and the 64 MiB v7x physical VMEM.
    bytes_per_b = S * D * jnp.dtype(x.dtype).itemsize
    tb = max(1, min(B, (2 << 20) // max(bytes_per_b, 1)))
    grid = (pl.cdiv(B, tb),)

    xlike_spec = pl.BlockSpec((tb, S, D), lambda i: (i, 0, 0))
    pe_spec = pl.BlockSpec((tb, 1, D), lambda i: (i, 0, 0))

    cparams = pltpu.CompilerParams(dimension_semantics=("parallel",))
    out_shape = jax.ShapeDtypeStruct((B, S, D), x.dtype)

    if training and p > 0.0:
        if rng_key is None:
            rng_key = jax.random.PRNGKey(0)
        bits = jax.random.bits(rng_key, (B, S, D), dtype=jnp.uint32)
        threshold = min(int(round(float(p) * (1 << 32))), (1 << 32) - 1)
        kernel = functools.partial(
            _pe_add_dropout_kernel, threshold=threshold, scale=1.0 / (1.0 - float(p))
        )
        return pl.pallas_call(
            kernel,
            out_shape=out_shape,
            grid=grid,
            in_specs=[xlike_spec, pe_spec, xlike_spec],
            out_specs=xlike_spec,
            compiler_params=cparams,
        )(x, pe_slice, bits)

    return pl.pallas_call(
        _pe_add_kernel,
        out_shape=out_shape,
        grid=grid,
        in_specs=[xlike_spec, pe_spec],
        out_specs=xlike_spec,
        compiler_params=cparams,
    )(x, pe_slice)


# ----------------------------------------------------------------------------
# demo / self-check
# ----------------------------------------------------------------------------
if __name__ == "__main__":
    # Small shapes consistent with the forward (the module's own broadcast
    # requires batch == seq): batch=8, seq=8, d_model=128 (lane-dense last dim).
    B, S, D = 8, 8, 128
    key = jax.random.PRNGKey(0)
    x = jax.random.normal(key, (B, S, D), dtype=jnp.float32)

    pe = make_positional_encoding(D, max_len=64)
    ref = x + pe[:S]            # same broadcast torch performs (needs B == S)

    # Eval mode: dropout is the identity -> must match plain-JAX reference.
    out_eval = jax.block_until_ready(
        positional_encoding_forward(x, pe, p=0.1, training=False)
    )
    assert out_eval.shape == x.shape
    assert jnp.allclose(out_eval, ref, atol=1e-5, rtol=1e-5)

    # Training mode: each element is either 0 (dropped) or ref / (1 - p).
    p = 0.1
    out_train = jax.block_until_ready(
        positional_encoding_forward(
            x, pe, p=p, training=True, rng_key=jax.random.PRNGKey(1234)
        )
    )
    assert out_train.shape == x.shape
    scaled = ref / (1.0 - p)
    ok = jnp.logical_or(
        out_train == 0.0, jnp.isclose(out_train, scaled, atol=1e-5, rtol=1e-5)
    )
    assert bool(jnp.all(ok))

    print("KERNEL_OK")
</pallas_src>

<mosaic_0001>
module attributes {stable_mosaic.version = 11 : i64} {
  func.func @_pe_add_kernel(%arg0: i32, %arg1: memref<8x8x128xf32, #tpu.memory_space<vmem>>, %arg2: memref<8x1x128xf32, #tpu.memory_space<vmem>>, %arg3: memref<8x8x128xf32, #tpu.memory_space<vmem>>) attributes {dimension_semantics = [#tpu.dimension_semantics<parallel>], iteration_bounds = array<i64: 1>, scalar_prefetch = 0 : i64, scratch_operands = 0 : i64, tpu.core_type = #tpu.core_type<tc>, window_params = [{transform_indices = @transform_0, window_bounds = array<i64: 8, 8, 128>}, {transform_indices = @transform_1, window_bounds = array<i64: 8, 1, 128>}, {transform_indices = @transform_2, window_bounds = array<i64: 8, 8, 128>}]} {
    %c0 = arith.constant 0 : index
    %c0_0 = arith.constant 0 : index
    %c0_1 = arith.constant 0 : index
    %0 = vector.load %arg1[%c0, %c0_0, %c0_1] : memref<8x8x128xf32, #tpu.memory_space<vmem>>, vector<8x8x128xf32>
    %c0_2 = arith.constant 0 : index
    %c0_3 = arith.constant 0 : index
    %c0_4 = arith.constant 0 : index
    %1 = vector.load %arg2[%c0_2, %c0_3, %c0_4] : memref<8x1x128xf32, #tpu.memory_space<vmem>>, vector<8x1x128xf32>
    %2 = vector.broadcast %1 : vector<8x1x128xf32> to vector<8x8x128xf32>
    %3 = arith.addf %0, %2 : vector<8x8x128xf32>
    %c0_5 = arith.constant 0 : index
    %c0_6 = arith.constant 0 : index
    %c0_7 = arith.constant 0 : index
    %4 = vector.load %arg3[%c0_5, %c0_6, %c0_7] : memref<8x8x128xf32, #tpu.memory_space<vmem>>, vector<8x8x128xf32>
    tpu.vector_store %arg3[%c0_5, %c0_6, %c0_7], %3 {strides = array<i32>} : memref<8x8x128xf32, #tpu.memory_space<vmem>>, vector<8x8x128xf32>,
    return
  }
  func.func @transform_0(%arg0: i32) -> (i32, i32, i32) {
    %c0_i32 = arith.constant 0 : i32
    %c0_i32_0 = arith.constant 0 : i32
    %c0_i32_1 = arith.constant 0 : i32
    return %arg0, %c0_i32, %c0_i32_0 : i32, i32, i32
  }
  func.func @transform_1(%arg0: i32) -> (i32, i32, i32) {
    %c0_i32 = arith.constant 0 : i32
    %c0_i32_0 = arith.constant 0 : i32
    %c0_i32_1 = arith.constant 0 : i32
    return %arg0, %c0_i32, %c0_i32_0 : i32, i32, i32
  }
  func.func @transform_2(%arg0: i32) -> (i32, i32, i32) {
    %c0_i32 = arith.constant 0 : i32
    %c0_i32_0 = arith.constant 0 : i32
    %c0_i32_1 = arith.constant 0 : i32
    return %arg0, %c0_i32, %c0_i32_0 : i32, i32, i32
  }
}

</mosaic_0001>

<bundles_post_ra>
// kernel: tpu_custom_call.1
= control target key start
LH: loop header
LB: loop body
LE: loop exit
PB: predicated region body
PF: predicated region fallthrough
CT: control target
= control target key end

     0   :  { %7 = vsyncpa [#allocation3], 0  ;;  %s289_s0 = inlined_call_operand.hbm [shape: f32[8,8,128], index: 0, kind: input, shape index: {}]   ;;  %s290_s1 = inlined_call_operand.hbm [shape: f32[8,1,128], index: 1, kind: input, shape index: {}]   ;;  %s291_s2 = inlined_call_operand.hbm [shape: f32[8,8,128], index: 2, kind: output, shape index: {}]  }
   0x1   :  { %8 = vsyncpa [#allocation6], 0 }
   0x2   :  { %9 = vsyncpa [#allocation4], 0  ;;  %s225_s9 = smov [#allocation2]   ;;  %s153_s13 = scalar_lea.hbm %s289_s0, 1024 }
   0x3   :  { %s15_s10 = sshll.u32 %s225_s9, 4  ;;  %p154_p0 = scmp.ne.s32.totalorder %s289_s0, %s153_s13  ;;  %s16_s10 = int_to_ptr.vmem [resolvable:$true] %s15_s10 }
   0x4   :  { %p157_p1 = scmp.lt.u32.totalorder %s153_s13, %s289_s0 }
   0x6   :  { %p159_p2 = pnand %p157_p1, %p154_p0 }
   0x8   :  { %162 = shalt.err (!%p159_p2)
}
   0x9   :  { %s163_s18 = scalar_lea.vmem %s16_s10, 1024  ;;  %p168_p4 = scmp.lt.s32.totalorder %s16_s10, %s16_s10 }
   0xa   :  { %p164_p3 = scmp.ne.s32.totalorder %s16_s10, %s163_s18  ;;  %p169_p5 = scmp.lt.s32.totalorder %s163_s18, %s163_s18 }
   0xc   :  { %p170_p6 = por %p169_p5, %p168_p4 }
   0xe   :  { %p171_p7 = pnand %p170_p6, %p164_p3 }
  0x10   :  { %174 = shalt.err (!%p171_p7)
}
  0x11   :  { %s226_s19 = smov 128   ;;  %s227_s20 = smov 8  }
  0x12   :  { %21 = dma.hbm_to_vmem [thread:$0]  %s289_s0, 1024, %s16_s10, [#allocation3], %s226_s19, %s226_s19, %s227_s20  }
  0x13   :  { %s228_s23 = smov [#allocation5]   ;;  %s175_s27 = scalar_lea.hbm %s290_s1, 128 }
  0x14   :  { %s27_s24 = sshll.u32 %s228_s23, 4  ;;  %p176_p8 = scmp.ne.s32.totalorder %s290_s1, %s175_s27  ;;  %s28_s24 = int_to_ptr.vmem [resolvable:$true] %s27_s24 }
  0x15   :  { %p179_p9 = scmp.lt.u32.totalorder %s175_s27, %s290_s1 }
  0x17   :  { %p181_p10 = pnand %p179_p9, %p176_p8 }
  0x19   :  { %184 = shalt.err (!%p181_p10)
}
  0x1a   :  { %s185_s4 = scalar_lea.vmem %s28_s24, 128  ;;  %p190_p12 = scmp.lt.s32.totalorder %s28_s24, %s28_s24 }
  0x1b   :  { %p186_p11 = scmp.ne.s32.totalorder %s28_s24, %s185_s4  ;;  %p191_p13 = scmp.lt.s32.totalorder %s185_s4, %s185_s4 }
  0x1d   :  { %p192_p0 = por %p191_p13, %p190_p12 }
  0x1f   :  { %p193_p1 = pnand %p192_p0, %p186_p11 }
  0x21   :  { %196 = shalt.err (!%p193_p1)
}
  0x22   :  { %s229_s0 = smov 16   ;;  %s230_s5 = smov 1  }
  0x23   :  { %33 = dma.hbm_to_vmem [thread:$0]  %s290_s1, 128, %s28_s24, [#allocation6], %s229_s0, %s229_s0, %s230_s5  }
  0x24   :  { %219 = dma.done.wait [#allocation3], 1024  }
  0x25   :  { %220 = vsyncadd [#allocation3], 4294966272 }
  0x26   :  { %221 = dma.done.wait [#allocation6], 128  }
  0x27   :  { %222 = vsyncadd [#allocation6], 4294967168  ;;  %v40_v0 = vld [vmem:[#allocation2] sm:$0xff]  ;;  %v41_v2 = vld [vmem:[#allocation2 + $0x8] sm:$0xff]  ;;  %s231_s1 = smov [#allocation7]  }
  0x28   :  { %v138_v1 = vld [vmem:[#allocation5] ss:$0 sm:$0xff]  ;;  %v139_v4 = vld [vmem:[#allocation5 + $0x1] ss:$0 sm:$0xff]  ;;  %v42_v5 = vld [vmem:[#allocation2 + $0x10] sm:$0xff]  ;;  %s125_s8 = sshll.u32 %s231_s1, 4  ;;  %s126_s8 = int_to_ptr.vmem [resolvable:$true] %s125_s8 }
  0x29   :  { %v104_v3 = vadd.f32 %v138_v1, %v40_v0  ;;  %v140_v6 = vld [vmem:[#allocation5 + $0x2] ss:$0 sm:$0xff]  ;;  %v105_v7 = vadd.f32 %v139_v4, %v41_v2  ;;  %v43_v9 = vld [vmem:[#allocation2 + $0x18] sm:$0xff]  ;;  %v141_v10 = vld [vmem:[#allocation5 + $0x3] ss:$0 sm:$0xff]  ;;  %s197_s9 = scalar_lea.vmem %s126_s8, 1024  ;;  %p202_p3 = scmp.lt.s32.totalorder %s126_s8, %s126_s8 }
  0x2a   :  { %v106_v8 = vadd.f32 %v140_v6, %v42_v5  ;;  %v44_v11 = vld [vmem:[#allocation2 + $0x20] sm:$0xff]  ;;  %v107_v12 = vadd.f32 %v141_v10, %v43_v9  ;;  %v45_v14 = vld [vmem:[#allocation2 + $0x28] sm:$0xff]  ;;  %v46_v18 = vld [vmem:[#allocation2 + $0x30] sm:$0xff]  ;;  %p198_p2 = scmp.ne.s32.totalorder %s126_s8, %s197_s9  ;;  %p203_p4 = scmp.lt.s32.totalorder %s197_s9, %s197_s9 }
  0x2b   :  { %112 = vst [vmem:[#allocation7] sm:$0xff] %v104_v3  ;;  %v142_v13 = vld [vmem:[#allocation5 + $0x4] ss:$0 sm:$0xff]  ;;  %v143_v15 = vld [vmem:[#allocation5 + $0x5] ss:$0 sm:$0xff]  ;;  %113 = vst [vmem:[#allocation7 + $0x8] sm:$0xff] %v105_v7 }
  0x2c   :  { %114 = vst [vmem:[#allocation7 + $0x10] sm:$0xff] %v106_v8  ;;  %v108_v16 = vadd.f32 %v142_v13, %v44_v11  ;;  %v109_v17 = vadd.f32 %v143_v15, %v45_v14  ;;  %v144_v19 = vld [vmem:[#allocation5 + $0x6] ss:$0 sm:$0xff]  ;;  %v47_v20 = vld [vmem:[#allocation2 + $0x38] sm:$0xff]  ;;  %115 = vst [vmem:[#allocation7 + $0x18] sm:$0xff] %v107_v12  ;;  %p204_p5 = por %p203_p4, %p202_p3 }
  0x2d   :  { %v110_v21 = vadd.f32 %v144_v19, %v46_v18  ;;  %v145_v22 = vld [vmem:[#allocation5 + $0x7] ss:$0 sm:$0xff] }
  0x2e   :  { %116 = vst [vmem:[#allocation7 + $0x20] sm:$0xff] %v108_v16  ;;  %117 = vst [vmem:[#allocation7 + $0x28] sm:$0xff] %v109_v17  ;;  %v111_v23 = vadd.f32 %v145_v22, %v47_v20  ;;  %p205_p6 = pnand %p204_p5, %p198_p2 }
  0x2f   :  { %118 = vst [vmem:[#allocation7 + $0x30] sm:$0xff] %v110_v21 }
  0x30   :  { %119 = vst [vmem:[#allocation7 + $0x38] sm:$0xff] %v111_v23 }
  0x31   :  { %208 = shalt.err (!%p205_p6)
}
  0x32   :  { %s209_s12 = scalar_lea.hbm %s291_s2, 1024 }
  0x33   :  { %p210_p7 = scmp.ne.s32.totalorder %s291_s2, %s209_s12  ;;  %p213_p8 = scmp.lt.u32.totalorder %s209_s12, %s291_s2 }
  0x35   :  { %p215_p9 = pnand %p213_p8, %p210_p7 }
  0x37   :  { %218 = shalt.err (!%p215_p9)
}
  0x38   :  { %131 = dma.vmem_to_hbm [thread:$0]  %s126_s8, 1024, %s291_s2, [#allocation4], %s226_s19, %s226_s19, %s227_s20  }
  0x39   :  { %223 = dma.done.wait [#allocation4], 1024  }
  0x3a   :  { %224 = vsyncadd [#allocation4], 4294966272 }
  0x3b   :  { %135 = vsyncpa [#allocation3], 1 }
  0x3c   :  { %136 = vsyncpa [#allocation6], 1 }
  0x3d   :  { %137 = vsyncpa [#allocation4], 1 }

</bundles_post_ra>
